<compile_context>
chip_gen: v7x
topology: tpu7x:2x2x1
jax: 0.10.0
libtpu: 0.0.40
codegen_flags: <defaults>
</compile_context>

<pallas_src>
import functools

import jax
import jax.numpy as jnp
from jax.experimental import pallas as pl
from jax.experimental.pallas import tpu as pltpu

BN_EPS = 1e-5

# Scoped-VMEM budget: leaves ~25% headroom on v7x (64 MiB/TC), conservative on
# v5e/v6e (128 MiB/TC).
_VMEM_LIMIT_BYTES = 48 * 1024 * 1024


def _round_up(v, m):
    return ((v + m - 1) // m) * m


def _auto_block_k(dim):
    """K tile for the first (dim -> H1) matmul; falls back to the full dim."""
    for tk in (2048, 1024, 512, 256, 128):
        if dim % tk == 0:
            return tk
    return dim


def _auto_block_m(n, block_k, h1_dim, itemsize):
    """Largest N tile that keeps pass 1 comfortably inside the VMEM budget."""
    # Double-buffered x tile + double-buffered h1 tile + f32 accumulator, after
    # reserving room for a double-buffered (block_k, H1) w1 block.
    w1_bytes = 2 * block_k * h1_dim * itemsize
    budget = max(_VMEM_LIMIT_BYTES - w1_bytes, _VMEM_LIMIT_BYTES // 4)
    row_bytes = 2 * block_k * itemsize + 2 * h1_dim * itemsize + 4 * h1_dim
    for tm in (1024, 512, 256, 128, 64, 32, 16, 8):
        if n % tm == 0 and tm * row_bytes <= budget:
            return tm
    return n


# --------------------------------------------------------------------------- #
# Kernels
# --------------------------------------------------------------------------- #
def _linear1_relu_stats_kernel(x_ref, w1_ref, b1_ref, h1_ref, stats_ref, acc_ref):
    """Pass 1: h1 = relu(x @ w1 + b1) (K-tiled) + per-tile BN1 sum / sumsq."""
    k = pl.program_id(1)

    @pl.when(k == 0)
    def _():
        acc_ref[...] = jnp.zeros_like(acc_ref)

    acc_ref[...] += jnp.dot(x_ref[...], w1_ref[...],
                            preferred_element_type=jnp.float32)

    @pl.when(k == pl.num_programs(1) - 1)
    def _():
        h1 = jnp.maximum(acc_ref[...] + b1_ref[...], 0.0)      # (TM, H1) f32
        h1_ref[...] = h1.astype(h1_ref.dtype)                  # spill for passes 2/3
        # Partial BatchNorm statistics (sum / sum-of-squares form).
        stats_ref[0, 0:1, :] = jnp.sum(h1, axis=0, keepdims=True)
        stats_ref[0, 1:2, :] = jnp.sum(h1 * h1, axis=0, keepdims=True)


def _linear2_relu_stats_kernel(h1_ref, w2_ref, b2_ref, stats_ref):
    """Pass 2: h2 = relu(h1 @ w2_folded + b2_folded) + per-tile BN2 sum / sumsq."""
    h2 = jnp.dot(h1_ref[...], w2_ref[...], preferred_element_type=jnp.float32)
    h2 = jnp.maximum(h2 + b2_ref[...], 0.0)                    # (TM, H2) f32
    stats_ref[0, 0:1, :] = jnp.sum(h2, axis=0, keepdims=True)
    stats_ref[0, 1:2, :] = jnp.sum(h2 * h2, axis=0, keepdims=True)


def _output_kernel(h1_ref, w2_ref, b2_ref, w3_ref, b3_ref, o_ref):
    """Pass 3: out = relu(h1 @ w2f + b2f) @ w3_folded + b3_folded (lane-padded)."""
    h2 = jnp.dot(h1_ref[...], w2_ref[...], preferred_element_type=jnp.float32)
    h2 = jnp.maximum(h2 + b2_ref[...], 0.0)
    out = jnp.dot(h2.astype(w3_ref.dtype), w3_ref[...],
                  preferred_element_type=jnp.float32) + b3_ref[...]
    o_ref[...] = out.astype(o_ref.dtype)                       # (TM, 128k) lane-dense


# --------------------------------------------------------------------------- #
# Wrapper
# --------------------------------------------------------------------------- #
def pixel_classifier_forward(x, params, *, block_m=None, block_k=None,
                             compute_dtype=jnp.bfloat16):
    """pixel_classifier forward (training-mode BatchNorm).

    x: (N, dim) float32.  params: see init_params.  Returns (N, numpy_class) f32.
    """
    f32 = jnp.float32
    n, dim = x.shape
    h1_dim = params["w1"].shape[1]
    h2_dim = params["w2"].shape[1]
    num_class = params["w3"].shape[1]
    cpad = _round_up(num_class, 128)             # lane-dense output slab
    itemsize = jnp.dtype(compute_dtype).itemsize

    if block_k is None:
        block_k = _auto_block_k(dim)
    if block_m is None:
        block_m = _auto_block_m(n, block_k, h1_dim, itemsize)
    # TODO(synk): pad/mask ragged N or dim instead of requiring divisibility.
    assert n % block_m == 0 and dim % block_k == 0
    n_tiles = n // block_m
    k_tiles = dim // block_k

    x_c = x.astype(compute_dtype)
    w1 = params["w1"].astype(compute_dtype)
    b1 = params["b1"].reshape(1, h1_dim).astype(f32)

    make_params = functools.partial(pltpu.CompilerParams,
                                    vmem_limit_bytes=_VMEM_LIMIT_BYTES)

    # ---- Pass 1: h1 = relu(x @ w1 + b1), spilled to HBM + partial BN1 stats ----
    h1_spill, stats1 = pl.pallas_call(
        _linear1_relu_stats_kernel,
        grid=(n_tiles, k_tiles),
        in_specs=[
            pl.BlockSpec((block_m, block_k), lambda i, k: (i, k)),
            pl.BlockSpec((block_k, h1_dim), lambda i, k: (k, 0)),
            pl.BlockSpec((1, h1_dim), lambda i, k: (0, 0)),
        ],
        out_specs=[
            pl.BlockSpec((block_m, h1_dim), lambda i, k: (i, 0)),
            pl.BlockSpec((1, 2, h1_dim), lambda i, k: (i, 0, 0)),
        ],
        out_shape=[
            jax.ShapeDtypeStruct((n, h1_dim), compute_dtype),
            jax.ShapeDtypeStruct((n_tiles, 2, h1_dim), f32),
        ],
        scratch_shapes=[pltpu.VMEM((block_m, h1_dim), f32)],
        compiler_params=make_params(
            dimension_semantics=("parallel", "arbitrary")),
        cost_estimate=pl.CostEstimate(
            flops=2 * n * dim * h1_dim,
            transcendentals=0,
            bytes_accessed=int(n * dim * itemsize
                               + n_tiles * dim * h1_dim * itemsize
                               + n * h1_dim * itemsize
                               + n_tiles * 2 * h1_dim * 4)),
    )(x_c, w1, b1)

    # ---- BatchNorm1d(H1), training mode, folded into Linear2 ----
    sum1, sumsq1 = stats1[:, 0, :].sum(axis=0), stats1[:, 1, :].sum(axis=0)
    mean1 = sum1 / n
    var1 = sumsq1 / n - mean1 * mean1                      # biased batch variance
    scale1 = params["g1"].astype(f32) * jax.lax.rsqrt(var1 + BN_EPS)
    shift1 = params["be1"].astype(f32) - mean1 * scale1
    w2_f = params["w2"].astype(f32)
    w2_fold = (scale1[:, None] * w2_f).astype(compute_dtype)
    b2_fold = (shift1 @ w2_f + params["b2"].astype(f32)).reshape(1, h2_dim)

    # ---- Pass 2: partial BN2 stats over h2 = relu(h1 @ w2_fold + b2_fold) ----
    stats2 = pl.pallas_call(
        _linear2_relu_stats_kernel,
        grid=(n_tiles,),
        in_specs=[
            pl.BlockSpec((block_m, h1_dim), lambda i: (i, 0)),
            pl.BlockSpec((h1_dim, h2_dim), lambda i: (0, 0)),   # resident weights
            pl.BlockSpec((1, h2_dim), lambda i: (0, 0)),
        ],
        out_specs=pl.BlockSpec((1, 2, h2_dim), lambda i: (i, 0, 0)),
        out_shape=jax.ShapeDtypeStruct((n_tiles, 2, h2_dim), f32),
        compiler_params=make_params(dimension_semantics=("parallel",)),
        cost_estimate=pl.CostEstimate(
            flops=2 * n * h1_dim * h2_dim,
            transcendentals=0,
            bytes_accessed=int(n * h1_dim * itemsize
                               + h1_dim * h2_dim * itemsize
                               + n_tiles * 2 * h2_dim * 4)),
    )(h1_spill, w2_fold, b2_fold)

    # ---- BatchNorm1d(H2) folded into Linear3 (padded to 128 output lanes) ----
    sum2, sumsq2 = stats2[:, 0, :].sum(axis=0), stats2[:, 1, :].sum(axis=0)
    mean2 = sum2 / n
    var2 = sumsq2 / n - mean2 * mean2
    scale2 = params["g2"].astype(f32) * jax.lax.rsqrt(var2 + BN_EPS)
    shift2 = params["be2"].astype(f32) - mean2 * scale2
    w3_f = params["w3"].astype(f32)
    w3_fold = scale2[:, None] * w3_f                       # (H2, num_class)
    b3_fold = shift2 @ w3_f + params["b3"].astype(f32)     # (num_class,)
    w3_fold = jnp.pad(w3_fold, ((0, 0), (0, cpad - num_class))).astype(compute_dtype)
    b3_fold = jnp.pad(b3_fold, (0, cpad - num_class)).reshape(1, cpad)

    # ---- Pass 3: logits, lane-dense (TM, cpad) stores ----
    out_pad = pl.pallas_call(
        _output_kernel,
        grid=(n_tiles,),
        in_specs=[
            pl.BlockSpec((block_m, h1_dim), lambda i: (i, 0)),
            pl.BlockSpec((h1_dim, h2_dim), lambda i: (0, 0)),
            pl.BlockSpec((1, h2_dim), lambda i: (0, 0)),
            pl.BlockSpec((h2_dim, cpad), lambda i: (0, 0)),
            pl.BlockSpec((1, cpad), lambda i: (0, 0)),
        ],
        out_specs=pl.BlockSpec((block_m, cpad), lambda i: (i, 0)),
        out_shape=jax.ShapeDtypeStruct((n, cpad), f32),
        compiler_params=make_params(dimension_semantics=("parallel",)),
        cost_estimate=pl.CostEstimate(
            flops=2 * n * h1_dim * h2_dim + 2 * n * h2_dim * cpad,
            transcendentals=0,
            bytes_accessed=int(n * h1_dim * itemsize
                               + (h1_dim * h2_dim + h2_dim * cpad) * itemsize
                               + n * cpad * 4)),
    )(h1_spill, w2_fold, b2_fold, w3_fold, b3_fold)

    return out_pad[:, :num_class]   # slice the lane padding off in the wrapper


# --------------------------------------------------------------------------- #
# Parameter init matching the torch module + pure-JAX reference
# --------------------------------------------------------------------------- #
def init_params(key, dim, numpy_class):
    """Matches pixel_classifier.__init__ + init_weights('normal', gain=0.02)."""
    if numpy_class < 32:
        h1, h2 = 128, 32
    else:
        h1, h2 = 256, 128
    k1, k2, k3 = jax.random.split(key, 3)
    gain = 0.02
    return {
        # Linear weights stored as (in, out) so the kernels compute x @ W.
        "w1": gain * jax.random.normal(k1, (dim, h1), jnp.float32),
        "b1": jnp.zeros((h1,), jnp.float32),
        "g1": jnp.ones((h1,), jnp.float32),    # BatchNorm1d weight (torch default)
        "be1": jnp.zeros((h1,), jnp.float32),  # BatchNorm1d bias
        "w2": gain * jax.random.normal(k2, (h1, h2), jnp.float32),
        "b2": jnp.zeros((h2,), jnp.float32),
        "g2": jnp.ones((h2,), jnp.float32),
        "be2": jnp.zeros((h2,), jnp.float32),
        "w3": gain * jax.random.normal(k3, (h2, numpy_class), jnp.float32),
        "b3": jnp.zeros((numpy_class,), jnp.float32),
    }


def _bn_train_ref(h, gamma, beta):
    # Torch BatchNorm1d in training mode: batch mean, biased batch variance.
    mean = jnp.mean(h, axis=0, keepdims=True)
    var = jnp.mean((h - mean) ** 2, axis=0, keepdims=True)
    return (h - mean) * jax.lax.rsqrt(var + BN_EPS) * gamma + beta


def _reference(x, p):
    h = jnp.maximum(x @ p["w1"] + p["b1"], 0.0)
    h = _bn_train_ref(h, p["g1"], p["be1"])
    h = jnp.maximum(h @ p["w2"] + p["b2"], 0.0)
    h = _bn_train_ref(h, p["g2"], p["be2"])
    return h @ p["w3"] + p["b3"]


if __name__ == "__main__":
    key = jax.random.PRNGKey(0)
    kx, kp = jax.random.split(key)

    N, DIM, NUM_CLASS = 64, 32, 10   # numpy_class < 32 branch -> hidden 128, 32

    x = jax.random.normal(kx, (N, DIM), jnp.float32)
    params = init_params(kp, DIM, NUM_CLASS)

    ref = _reference(x, params)

    fwd = jax.jit(pixel_classifier_forward,
                  static_argnames=("block_m", "block_k", "compute_dtype"))

    # f32 path (tight check against the torch-style reference); block_m=16
    # deliberately exercises the multi-tile (N-grid) path at this toy size.
    out_f32 = jax.block_until_ready(
        fwd(x, params, block_m=16, compute_dtype=jnp.float32))
    assert out_f32.shape == (N, NUM_CLASS)
    assert jnp.allclose(out_f32, ref, atol=5e-3, rtol=5e-3), (
        float(jnp.max(jnp.abs(out_f32 - ref))))

    # bf16 MXU path (production default) — looser, deliberate tolerance.
    out_bf16 = jax.block_until_ready(
        fwd(x, params, block_m=16, compute_dtype=jnp.bfloat16))
    assert out_bf16.shape == (N, NUM_CLASS)
    assert jnp.allclose(out_bf16, ref, atol=5e-2, rtol=5e-2), (
        float(jnp.max(jnp.abs(out_bf16 - ref))))

    print("KERNEL_OK")
</pallas_src>

<mosaic_0001>
module attributes {stable_mosaic.version = 11 : i64} {
  func.func @_linear1_relu_stats_kernel(%arg0: i32, %arg1: i32, %arg2: memref<16x32xf32, #tpu.memory_space<vmem>>, %arg3: memref<32x128xf32, #tpu.memory_space<vmem>>, %arg4: memref<1x128xf32, #tpu.memory_space<vmem>>, %arg5: memref<16x128xf32, #tpu.memory_space<vmem>>, %arg6: memref<1x2x128xf32, #tpu.memory_space<vmem>>, %arg7: memref<16x128xf32, #tpu.memory_space<vmem>>) attributes {dimension_semantics = [#tpu.dimension_semantics<parallel>, #tpu.dimension_semantics<arbitrary>], iteration_bounds = array<i64: 4, 1>, scalar_prefetch = 0 : i64, scratch_operands = 1 : i64, tpu.core_type = #tpu.core_type<tc>, window_params = [{transform_indices = @transform_0, window_bounds = array<i64: 16, 32>}, {transform_indices = @transform_1, window_bounds = array<i64: 32, 128>}, {pipeline_mode = #tpu.pipeline_mode<synchronous>, transform_indices = @transform_2, window_bounds = array<i64: 1, 128>}, {transform_indices = @transform_3, window_bounds = array<i64: 16, 128>}, {transform_indices = @transform_4, window_bounds = array<i64: 1, 2, 128>}]} {
    %c0_i32 = arith.constant 0 : i32
    %0 = arith.cmpi eq, %arg1, %c0_i32 : i32
    %1 = arith.extui %0 : i1 to i32
    %c0_i32_0 = arith.constant 0 : i32
    %2 = arith.cmpi ne, %1, %c0_i32_0 : i32
    scf.if %2 {
      %cst_10 = arith.constant 0.000000e+00 : f32
      %12 = vector.broadcast %cst_10 : f32 to vector<16x128xf32>
      %c0_11 = arith.constant 0 : index
      %c0_12 = arith.constant 0 : index
      %13 = vector.load %arg7[%c0_11, %c0_12] : memref<16x128xf32, #tpu.memory_space<vmem>>, vector<16x128xf32>
      tpu.vector_store %arg7[%c0_11, %c0_12], %12 {strides = array<i32>} : memref<16x128xf32, #tpu.memory_space<vmem>>, vector<16x128xf32>,
    } else {
    }
    %c0 = arith.constant 0 : index
    %c0_1 = arith.constant 0 : index
    %3 = vector.load %arg7[%c0, %c0_1] : memref<16x128xf32, #tpu.memory_space<vmem>>, vector<16x128xf32>
    %c0_2 = arith.constant 0 : index
    %c0_3 = arith.constant 0 : index
    %4 = vector.load %arg2[%c0_2, %c0_3] : memref<16x32xf32, #tpu.memory_space<vmem>>, vector<16x32xf32>
    %c0_4 = arith.constant 0 : index
    %c0_5 = arith.constant 0 : index
    %5 = vector.load %arg3[%c0_4, %c0_5] : memref<32x128xf32, #tpu.memory_space<vmem>>, vector<32x128xf32>
    %cst = arith.constant dense<0.000000e+00> : vector<16x128xf32>
    %6 = tpu.matmul %4, %5, %cst {dimension_numbers = #tpu.dot_dimension_numbers<[1], [0], [0], [1], [0, 0, 1, 1], [], []>} : vector<16x32xf32>, vector<32x128xf32>, vector<16x128xf32> -> vector<16x128xf32>
    %7 = arith.addf %3, %6 : vector<16x128xf32>
    %c0_6 = arith.constant 0 : index
    %c0_7 = arith.constant 0 : index
    %8 = vector.load %arg7[%c0_6, %c0_7] : memref<16x128xf32, #tpu.memory_space<vmem>>, vector<16x128xf32>
    tpu.vector_store %arg7[%c0_6, %c0_7], %7 {strides = array<i32>} : memref<16x128xf32, #tpu.memory_space<vmem>>, vector<16x128xf32>,
    %c0_i32_8 = arith.constant 0 : i32
    %9 = arith.cmpi eq, %arg1, %c0_i32_8 : i32
    %10 = arith.extui %9 : i1 to i32
    %c0_i32_9 = arith.constant 0 : i32
    %11 = arith.cmpi ne, %10, %c0_i32_9 : i32
    scf.if %11 {
      %c0_10 = arith.constant 0 : index
      %c0_11 = arith.constant 0 : index
      %12 = vector.load %arg7[%c0_10, %c0_11] : memref<16x128xf32, #tpu.memory_space<vmem>>, vector<16x128xf32>
      %c0_12 = arith.constant 0 : index
      %c0_13 = arith.constant 0 : index
      %13 = vector.load %arg4[%c0_12, %c0_13] : memref<1x128xf32, #tpu.memory_space<vmem>>, vector<1x128xf32>
      %14 = vector.broadcast %13 : vector<1x128xf32> to vector<16x128xf32>
      %15 = arith.addf %12, %14 : vector<16x128xf32>
      %cst_14 = arith.constant 0.000000e+00 : f32
      %16 = vector.broadcast %cst_14 : f32 to vector<16x128xf32>
      %17 = arith.maximumf %15, %16 : vector<16x128xf32>
      %c0_15 = arith.constant 0 : index
      %c0_16 = arith.constant 0 : index
      %18 = vector.load %arg5[%c0_15, %c0_16] : memref<16x128xf32, #tpu.memory_space<vmem>>, vector<16x128xf32>
      tpu.vector_store %arg5[%c0_15, %c0_16], %17 {strides = array<i32>} : memref<16x128xf32, #tpu.memory_space<vmem>>, vector<16x128xf32>,
      %cst_17 = arith.constant dense<0.000000e+00> : vector<128xf32>
      %19 = vector.multi_reduction <add>, %17, %cst_17 [0] : vector<16x128xf32> to vector<128xf32>
      %20 = vector.shape_cast %19 : vector<128xf32> to vector<1x128xf32>
      %c0_18 = arith.constant 0 : index
      %c0_19 = arith.constant 0 : index
      %c0_20 = arith.constant 0 : index
      %21 = vector.load %arg6[%c0_18, %c0_19, %c0_20] : memref<1x2x128xf32, #tpu.memory_space<vmem>>, vector<1x1x128xf32>
      %22 = vector.shape_cast %21 : vector<1x1x128xf32> to vector<1x128xf32>
      %23 = vector.shape_cast %20 : vector<1x128xf32> to vector<1x1x128xf32>
      tpu.vector_store %arg6[%c0_18, %c0_19, %c0_20], %23 {strides = array<i32>} : memref<1x2x128xf32, #tpu.memory_space<vmem>>, vector<1x1x128xf32>,
      %24 = arith.mulf %17, %17 : vector<16x128xf32>
      %cst_21 = arith.constant dense<0.000000e+00> : vector<128xf32>
      %25 = vector.multi_reduction <add>, %24, %cst_21 [0] : vector<16x128xf32> to vector<128xf32>
      %26 = vector.shape_cast %25 : vector<128xf32> to vector<1x128xf32>
      %c0_22 = arith.constant 0 : index
      %c1 = arith.constant 1 : index
      %c0_23 = arith.constant 0 : index
      %27 = vector.load %arg6[%c0_22, %c1, %c0_23] : memref<1x2x128xf32, #tpu.memory_space<vmem>>, vector<1x1x128xf32>
      %28 = vector.shape_cast %27 : vector<1x1x128xf32> to vector<1x128xf32>
      %29 = vector.shape_cast %26 : vector<1x128xf32> to vector<1x1x128xf32>
      tpu.vector_store %arg6[%c0_22, %c1, %c0_23], %29 {strides = array<i32>} : memref<1x2x128xf32, #tpu.memory_space<vmem>>, vector<1x1x128xf32>,
    } else {
    }
    return
  }
  func.func @transform_0(%arg0: i32, %arg1: i32) -> (i32, i32) {
    %c0_i32 = arith.constant 0 : i32
    return %arg0, %arg1 : i32, i32
  }
  func.func @transform_1(%arg0: i32, %arg1: i32) -> (i32, i32) {
    %c0_i32 = arith.constant 0 : i32
    %c0_i32_0 = arith.constant 0 : i32
    return %arg1, %c0_i32 : i32, i32
  }
  func.func @transform_2(%arg0: i32, %arg1: i32) -> (i32, i32) {
    %c0_i32 = arith.constant 0 : i32
    %c0_i32_0 = arith.constant 0 : i32
    %c0_i32_1 = arith.constant 0 : i32
    return %c0_i32, %c0_i32_0 : i32, i32
  }
  func.func @transform_3(%arg0: i32, %arg1: i32) -> (i32, i32) {
    %c0_i32 = arith.constant 0 : i32
    %c0_i32_0 = arith.constant 0 : i32
    return %arg0, %c0_i32 : i32, i32
  }
  func.func @transform_4(%arg0: i32, %arg1: i32) -> (i32, i32, i32) {
    %c0_i32 = arith.constant 0 : i32
    %c0_i32_0 = arith.constant 0 : i32
    %c0_i32_1 = arith.constant 0 : i32
    return %arg0, %c0_i32, %c0_i32_0 : i32, i32, i32
  }
}

module attributes {stable_mosaic.version = 11 : i64} {
  func.func @_linear2_relu_stats_kernel(%arg0: i32, %arg1: memref<16x128xf32, #tpu.memory_space<vmem>>, %arg2: memref<128x32xf32, #tpu.memory_space<vmem>>, %arg3: memref<1x32xf32, #tpu.memory_space<vmem>>, %arg4: memref<1x2x32xf32, #tpu.memory_space<vmem>>) attributes {dimension_semantics = [#tpu.dimension_semantics<parallel>], iteration_bounds = array<i64: 4>, scalar_prefetch = 0 : i64, scratch_operands = 0 : i64, tpu.core_type = #tpu.core_type<tc>, window_params = [{transform_indices = @transform_0, window_bounds = array<i64: 16, 128>}, {pipeline_mode = #tpu.pipeline_mode<synchronous>, transform_indices = @transform_1, window_bounds = array<i64: 128, 32>}, {pipeline_mode = #tpu.pipeline_mode<synchronous>, transform_indices = @transform_2, window_bounds = array<i64: 1, 32>}, {transform_indices = @transform_3, window_bounds = array<i64: 1, 2, 32>}]} {
    %c0 = arith.constant 0 : index
    %c0_0 = arith.constant 0 : index
    %0 = vector.load %arg1[%c0, %c0_0] : memref<16x128xf32, #tpu.memory_space<vmem>>, vector<16x128xf32>
    %c0_1 = arith.constant 0 : index
    %c0_2 = arith.constant 0 : index
    %1 = vector.load %arg2[%c0_1, %c0_2] : memref<128x32xf32, #tpu.memory_space<vmem>>, vector<128x32xf32>
    %cst = arith.constant dense<0.000000e+00> : vector<16x32xf32>
    %2 = tpu.matmul %0, %1, %cst {dimension_numbers = #tpu.dot_dimension_numbers<[1], [0], [0], [1], [0, 0, 1, 1], [], []>} : vector<16x128xf32>, vector<128x32xf32>, vector<16x32xf32> -> vector<16x32xf32>
    %c0_3 = arith.constant 0 : index
    %c0_4 = arith.constant 0 : index
    %3 = vector.load %arg3[%c0_3, %c0_4] : memref<1x32xf32, #tpu.memory_space<vmem>>, vector<1x32xf32>
    %4 = vector.broadcast %3 : vector<1x32xf32> to vector<16x32xf32>
    %5 = arith.addf %2, %4 : vector<16x32xf32>
    %cst_5 = arith.constant 0.000000e+00 : f32
    %6 = vector.broadcast %cst_5 : f32 to vector<16x32xf32>
    %7 = arith.maximumf %5, %6 : vector<16x32xf32>
    %cst_6 = arith.constant dense<0.000000e+00> : vector<32xf32>
    %8 = vector.multi_reduction <add>, %7, %cst_6 [0] : vector<16x32xf32> to vector<32xf32>
    %9 = vector.shape_cast %8 : vector<32xf32> to vector<1x32xf32>
    %c0_7 = arith.constant 0 : index
    %c0_8 = arith.constant 0 : index
    %c0_9 = arith.constant 0 : index
    %10 = vector.load %arg4[%c0_7, %c0_8, %c0_9] : memref<1x2x32xf32, #tpu.memory_space<vmem>>, vector<1x1x32xf32>
    %11 = vector.shape_cast %10 : vector<1x1x32xf32> to vector<1x32xf32>
    %12 = vector.shape_cast %9 : vector<1x32xf32> to vector<1x1x32xf32>
    tpu.vector_store %arg4[%c0_7, %c0_8, %c0_9], %12 {strides = array<i32>} : memref<1x2x32xf32, #tpu.memory_space<vmem>>, vector<1x1x32xf32>,
    %13 = arith.mulf %7, %7 : vector<16x32xf32>
    %cst_10 = arith.constant dense<0.000000e+00> : vector<32xf32>
    %14 = vector.multi_reduction <add>, %13, %cst_10 [0] : vector<16x32xf32> to vector<32xf32>
    %15 = vector.shape_cast %14 : vector<32xf32> to vector<1x32xf32>
    %c0_11 = arith.constant 0 : index
    %c1 = arith.constant 1 : index
    %c0_12 = arith.constant 0 : index
    %16 = vector.load %arg4[%c0_11, %c1, %c0_12] : memref<1x2x32xf32, #tpu.memory_space<vmem>>, vector<1x1x32xf32>
    %17 = vector.shape_cast %16 : vector<1x1x32xf32> to vector<1x32xf32>
    %18 = vector.shape_cast %15 : vector<1x32xf32> to vector<1x1x32xf32>
    tpu.vector_store %arg4[%c0_11, %c1, %c0_12], %18 {strides = array<i32>} : memref<1x2x32xf32, #tpu.memory_space<vmem>>, vector<1x1x32xf32>,
    return
  }
  func.func @transform_0(%arg0: i32) -> (i32, i32) {
    %c0_i32 = arith.constant 0 : i32
    %c0_i32_0 = arith.constant 0 : i32
    return %arg0, %c0_i32 : i32, i32
  }
  func.func @transform_1(%arg0: i32) -> (i32, i32) {
    %c0_i32 = arith.constant 0 : i32
    %c0_i32_0 = arith.constant 0 : i32
    %c0_i32_1 = arith.constant 0 : i32
    return %c0_i32, %c0_i32_0 : i32, i32
  }
  func.func @transform_2(%arg0: i32) -> (i32, i32) {
    %c0_i32 = arith.constant 0 : i32
    %c0_i32_0 = arith.constant 0 : i32
    %c0_i32_1 = arith.constant 0 : i32
    return %c0_i32, %c0_i32_0 : i32, i32
  }
  func.func @transform_3(%arg0: i32) -> (i32, i32, i32) {
    %c0_i32 = arith.constant 0 : i32
    %c0_i32_0 = arith.constant 0 : i32
    %c0_i32_1 = arith.constant 0 : i32
    return %arg0, %c0_i32, %c0_i32_0 : i32, i32, i32
  }
}

module attributes {stable_mosaic.version = 11 : i64} {
  func.func @_output_kernel(%arg0: i32, %arg1: memref<16x128xf32, #tpu.memory_space<vmem>>, %arg2: memref<128x32xf32, #tpu.memory_space<vmem>>, %arg3: memref<1x32xf32, #tpu.memory_space<vmem>>, %arg4: memref<32x128xf32, #tpu.memory_space<vmem>>, %arg5: memref<1x128xf32, #tpu.memory_space<vmem>>, %arg6: memref<16x128xf32, #tpu.memory_space<vmem>>) attributes {dimension_semantics = [#tpu.dimension_semantics<parallel>], iteration_bounds = array<i64: 4>, scalar_prefetch = 0 : i64, scratch_operands = 0 : i64, tpu.core_type = #tpu.core_type<tc>, window_params = [{transform_indices = @transform_0, window_bounds = array<i64: 16, 128>}, {pipeline_mode = #tpu.pipeline_mode<synchronous>, transform_indices = @transform_1, window_bounds = array<i64: 128, 32>}, {pipeline_mode = #tpu.pipeline_mode<synchronous>, transform_indices = @transform_2, window_bounds = array<i64: 1, 32>}, {pipeline_mode = #tpu.pipeline_mode<synchronous>, transform_indices = @transform_3, window_bounds = array<i64: 32, 128>}, {pipeline_mode = #tpu.pipeline_mode<synchronous>, transform_indices = @transform_4, window_bounds = array<i64: 1, 128>}, {transform_indices = @transform_5, window_bounds = array<i64: 16, 128>}]} {
    %c0 = arith.constant 0 : index
    %c0_0 = arith.constant 0 : index
    %0 = vector.load %arg1[%c0, %c0_0] : memref<16x128xf32, #tpu.memory_space<vmem>>, vector<16x128xf32>
    %c0_1 = arith.constant 0 : index
    %c0_2 = arith.constant 0 : index
    %1 = vector.load %arg2[%c0_1, %c0_2] : memref<128x32xf32, #tpu.memory_space<vmem>>, vector<128x32xf32>
    %cst = arith.constant dense<0.000000e+00> : vector<16x32xf32>
    %2 = tpu.matmul %0, %1, %cst {dimension_numbers = #tpu.dot_dimension_numbers<[1], [0], [0], [1], [0, 0, 1, 1], [], []>} : vector<16x128xf32>, vector<128x32xf32>, vector<16x32xf32> -> vector<16x32xf32>
    %c0_3 = arith.constant 0 : index
    %c0_4 = arith.constant 0 : index
    %3 = vector.load %arg3[%c0_3, %c0_4] : memref<1x32xf32, #tpu.memory_space<vmem>>, vector<1x32xf32>
    %4 = vector.broadcast %3 : vector<1x32xf32> to vector<16x32xf32>
    %5 = arith.addf %2, %4 : vector<16x32xf32>
    %cst_5 = arith.constant 0.000000e+00 : f32
    %6 = vector.broadcast %cst_5 : f32 to vector<16x32xf32>
    %7 = arith.maximumf %5, %6 : vector<16x32xf32>
    %c0_6 = arith.constant 0 : index
    %c0_7 = arith.constant 0 : index
    %8 = vector.load %arg4[%c0_6, %c0_7] : memref<32x128xf32, #tpu.memory_space<vmem>>, vector<32x128xf32>
    %cst_8 = arith.constant dense<0.000000e+00> : vector<16x128xf32>
    %9 = tpu.matmul %7, %8, %cst_8 {dimension_numbers = #tpu.dot_dimension_numbers<[1], [0], [0], [1], [0, 0, 1, 1], [], []>} : vector<16x32xf32>, vector<32x128xf32>, vector<16x128xf32> -> vector<16x128xf32>
    %c0_9 = arith.constant 0 : index
    %c0_10 = arith.constant 0 : index
    %10 = vector.load %arg5[%c0_9, %c0_10] : memref<1x128xf32, #tpu.memory_space<vmem>>, vector<1x128xf32>
    %11 = vector.broadcast %10 : vector<1x128xf32> to vector<16x128xf32>
    %12 = arith.addf %9, %11 : vector<16x128xf32>
    %c0_11 = arith.constant 0 : index
    %c0_12 = arith.constant 0 : index
    %13 = vector.load %arg6[%c0_11, %c0_12] : memref<16x128xf32, #tpu.memory_space<vmem>>, vector<16x128xf32>
    tpu.vector_store %arg6[%c0_11, %c0_12], %12 {strides = array<i32>} : memref<16x128xf32, #tpu.memory_space<vmem>>, vector<16x128xf32>,
    return
  }
  func.func @transform_0(%arg0: i32) -> (i32, i32) {
    %c0_i32 = arith.constant 0 : i32
    %c0_i32_0 = arith.constant 0 : i32
    return %arg0, %c0_i32 : i32, i32
  }
  func.func @transform_1(%arg0: i32) -> (i32, i32) {
    %c0_i32 = arith.constant 0 : i32
    %c0_i32_0 = arith.constant 0 : i32
    %c0_i32_1 = arith.constant 0 : i32
    return %c0_i32, %c0_i32_0 : i32, i32
  }
  func.func @transform_2(%arg0: i32) -> (i32, i32) {
    %c0_i32 = arith.constant 0 : i32
    %c0_i32_0 = arith.constant 0 : i32
    %c0_i32_1 = arith.constant 0 : i32
    return %c0_i32, %c0_i32_0 : i32, i32
  }
  func.func @transform_3(%arg0: i32) -> (i32, i32) {
    %c0_i32 = arith.constant 0 : i32
    %c0_i32_0 = arith.constant 0 : i32
    %c0_i32_1 = arith.constant 0 : i32
    return %c0_i32, %c0_i32_0 : i32, i32
  }
  func.func @transform_4(%arg0: i32) -> (i32, i32) {
    %c0_i32 = arith.constant 0 : i32
    %c0_i32_0 = arith.constant 0 : i32
    %c0_i32_1 = arith.constant 0 : i32
    return %c0_i32, %c0_i32_0 : i32, i32
  }
  func.func @transform_5(%arg0: i32) -> (i32, i32) {
    %c0_i32 = arith.constant 0 : i32
    %c0_i32_0 = arith.constant 0 : i32
    return %arg0, %c0_i32 : i32, i32
  }
}

</mosaic_0001>

<bundles_post_ra>
// kernel: pixel_classifier_forward.3
= control target key start
LH: loop header
LB: loop body
LE: loop exit
PB: predicated region body
PF: predicated region fallthrough
CT: control target
= control target key end

     0   :  { %s621_s15 = smov 0   ;;  %s623_s16 = smov 0   ;;  %s677_s0 = inlined_call_operand.vmem [shape: f32[64,32], index: 0, kind: input, shape index: {}]   ;;  %s678_s1 = inlined_call_operand.vmem [shape: f32[32,128], index: 1, kind: input, shape index: {}]   ;;  %s679_s2 = inlined_call_operand.vmem [shape: f32[1,128], index: 2, kind: input, shape index: {}]   ;;  %s680_s3 = inlined_call_operand.vmem [shape: f32[64,128], index: 3, kind: output, shape index: {0}]   ;;  %s681_s4 = inlined_call_operand.vmem [shape: f32[4,2,128], index: 4, kind: output, shape index: {1}]  }
   0x1   :  { %s625_s17 = smov 0  }
   0x2 LB: > { %s27_s18 = sadd.s32 1, %s590_s16  ;;  %p512_p0 = scmp.ge.s32.totalorder %s594_s17, 1  ;;  %s594_s17 = sphi %s625_s17, %s15_s17   ;;  %s590_s16 = sphi %s623_s16, %s683_s16   ;;  %s586_s15 = sphi %s621_s15, %s682_s15  }
   0x3   : > { %p29_p1 = scmp.ge.s32.totalorder %s27_s18, 4  ;;  %p194_p2 = scmp.lt.s32.totalorder %s594_s17, 5 }
   0x5   : > { %s685_s18 = smov (%p29_p1, %s27_s18), 0  ;;  %p195_p3 = pnand %p512_p0, %p194_p2 }
   0x6   : > { %v267_v0 = vld [vmem:[%s678_s1] sm:$0xff] (!%p195_p3)  ;;  %v268_v1 = vld [vmem:[%s678_s1 + $0x8] sm:$0xff] (!%p195_p3)  ;;  %v269_v2 = vld [vmem:[%s678_s1 + $0x10] sm:$0xff] (!%p195_p3)  ;;  %s513_s25 = sshll.u32 (!%p195_p3), %s586_s15, 1  ;;  %vm271_vm0 = vcmask (!%p195_p3), 261120   ;;  %p253_p5 = scmp.lt.s32.totalorder (!%p195_p3), %s586_s15, 3 }
   0x7   : > { %198 = sbr.rel (%p195_p3) target bundleno = 253 (0xfd), region = 32  ;;  %v540_v3 = vpack.c.bf16 (!%p195_p3), %v268_v1, %v267_v0  ;;  %v270_v4 = vld [vmem:[%s678_s1 + $0x18] sm:$0xff] (!%p195_p3)  ;;  %p233_p4 = scmp.lt.s32.totalorder (!%p195_p3), %s513_s25, 7  ;;  %v520_v8 = vld [vmem:[%s679_s2] ss:$0 sm:$0xff] (!%p195_p3) }
   0x8   : > { %v544_v5 = vpack.c.bf16 (!%p195_p3), %v270_v4, %v269_v2 }
   0x9   : > { %541 = vmatprep.subr.bf16.mxu0 (!%p195_p3), %v540_v3 }
   0xa   : > { %543 = vmatpush3.bf16.msra.mxu0 (!%p195_p3), %v540_v3 }
   0xb   : > { %545 = vmatprep.subr.bf16.mxu0 (!%p195_p3), %v544_v5 }
   0xe   : > { %s687_s25 = smov (!%p233_p4, %s513_s25), 7  ;;  %547 = vmatpush3.bf16.msra.mxu0 %v544_v5  ;;  %s689_s15 = smov (!%p253_p5, %s586_s15), 3 }
   0xf   : > { %s514_s28 = sshll.u32 %s687_s25, 3  ;;  %s517_s11 = sshll.u32 %s689_s15, 1 }
  0x10   : > { %s239_s5 = scalar_lea.vmem %s677_s0, %s514_s28  ;;  %s251_s10 = scalar_lea.vmem %s680_s3, %s514_s28 }
  0x11   : > { %v265_v6 = vld [vmem:[%s239_s5] sm:$0xff]  ;;  %v266_v7 = vld [vmem:[%s239_s5 + $0x8] sm:$0xff]  ;;  %s256_s14 = scalar_lea.vmem %s681_s4, %s517_s11 }
  0x12   : > { %537 = vmatprep.mubr.msk.f32.mxu0 %vm271_vm0, %v265_v6 }
  0x13   : > { %538 = vmatmul.mubr.msk.f32.vlgmr.msra.gmra.mrb[0].mxu0 %vm271_vm0, %v266_v7 }
  0xe6   : > { %v539_v9 = vpop.f32.mrb[0].mxu0 }
  0xe7   : > { %v370_v10 = vadd.f32 %v539_v9, %v520_v8  ;;  %v344_v11 = vpop.f32.mrb[1].mxu0 }
  0xe8   : > { %v369_v12 = vadd.f32 %v520_v8, %v344_v11 }
  0xe9   : > { %v372_v13 = vmax.f32 %v370_v10, 0.0 }
  0xea   : > { %v371_v14 = vmax.f32 %v369_v12, 0.0 }
  0xeb   : > { %v384_v15 = vmul.f32 %v372_v13, %v372_v13  ;;  %374 = vst [vmem:[%s251_s10 + $0x8] sm:$0xff] %v372_v13 }
  0xec   : > { %373 = vst [vmem:[%s251_s10] sm:$0xff] %v371_v14  ;;  %v375_v16 = vadd.f32 %v372_v13, %v371_v14  ;;  %v383_v17 = vmul.f32 %v371_v14, %v371_v14 }
  0xee   : > { %v376_v18 = vrot.slane %v375_v16, 4  ;;  %v385_v19 = vadd.f32 %v384_v15, %v383_v17 }
  0xf0   : > { %v377_v20 = vadd.f32 %v376_v18, %v375_v16  ;;  %v386_v21 = vrot.slane %v385_v19, 4 }
  0xf2   : > { %v378_v22 = vrot.slane %v377_v20, 2  ;;  %v387_v23 = vadd.f32 %v386_v21, %v385_v19 }
  0xf4   : > { %v379_v24 = vadd.f32 %v378_v22, %v377_v20  ;;  %v388_v25 = vrot.slane %v387_v23, 2 }
  0xf6   : > { %v380_v26 = vrot.slane %v379_v24, 1  ;;  %v389_v27 = vadd.f32 %v388_v25, %v387_v23 }
  0xf8   : > { %v381_v28 = vadd.f32 %v380_v26, %v379_v24  ;;  %v390_v29 = vrot.slane %v389_v27, 1 }
  0xfa   : > { %382 = vst [vmem:[%s256_s14] sm:$0x1] %v381_v28  ;;  %v391_v30 = vadd.f32 %v390_v29, %v389_v27 }
  0xfc   : > { %392 = vst [vmem:[%s256_s14 + $0x1] sm:$0x1] %v391_v30 }
  0xfd PF: > { %s15_s17 = sadd.s32 1, %s594_s17   ;;  %s682_s15 = smov %s590_s16 }
  0xfe   : > { %p12_p6 = scmp.ge.s32.totalorder %s15_s17, 6   ;;  %s683_s16 = smov %s685_s18 }
 0x100   :  { %14 = sbr.rel (!%p12_p6) target bundleno = 2 (0x2), region = 85 }

// kernel: pixel_classifier_forward.4
= control target key start
LH: loop header
LB: loop body
LE: loop exit
PB: predicated region body
PF: predicated region fallthrough
CT: control target
= control target key end

     0   :  { %s482_s12 = smov 0   ;;  %s555_s0 = inlined_call_operand.vmem [shape: f32[64,128], index: 0, kind: input, shape index: {}]   ;;  %s556_s1 = inlined_call_operand.vmem [shape: f32[128,32], index: 1, kind: input, shape index: {}]   ;;  %s557_s2 = inlined_call_operand.vmem [shape: f32[1,32], index: 2, kind: input, shape index: {}]   ;;  %s558_s3 = inlined_call_operand.vmem [shape: f32[4,2,32], index: 3, kind: output, shape index: {}]  }
   0x1 LB: > { %s488_s13 = sadd.s32 4294967295, %s460_s12   ;;  %p354_p0 = scmp.ge.s32.totalorder %s460_s12, 1  ;;  %s460_s12 = sphi %s482_s12, %s13_s12  }
   0x2   : > { %p138_p1 = scmp.lt.s32.totalorder %s460_s12, 5 }
   0x4   : > { %p139_p2 = pnand %p354_p0, %p138_p1 }
   0x5   : > { %v173_v0 = vld [vmem:[%s556_s1] sm:$0xff] (!%p139_p2)  ;;  %v174_v1 = vld [vmem:[%s556_s1 + $0x8] sm:$0xff] (!%p139_p2)  ;;  %v175_v2 = vld [vmem:[%s556_s1 + $0x10] sm:$0xff] (!%p139_p2)  ;;  %s355_s20 = sshll.u32 (!%p139_p2), %s488_s13, 1  ;;  %vm273_vm0 = vcmask (!%p139_p2), 261120   ;;  %p167_p4 = scmp.lt.s32.totalorder (!%p139_p2), %s488_s13, 3 }
   0x6   : > { %142 = sbr.rel (%p139_p2) target bundleno = 275 (0x113), region = 32  ;;  %v414_v3 = vpack.c.bf16 (!%p139_p2), %v174_v1, %v173_v0  ;;  %v176_v4 = vld [vmem:[%s556_s1 + $0x18] sm:$0xff] (!%p139_p2)  ;;  %p162_p3 = scmp.lt.s32.totalorder (!%p139_p2), %s355_s20, 7  ;;  %v177_v6 = vld [vmem:[%s556_s1 + $0x20] sm:$0xff] (!%p139_p2)  ;;  %v178_v7 = vld [vmem:[%s556_s1 + $0x28] sm:$0xff] (!%p139_p2)  ;;  %vm283_vm1 = vcmask (!%p139_p2), 253952  }
   0x7   : > { %v418_v5 = vpack.c.bf16 (!%p139_p2), %v176_v4, %v175_v2  ;;  %v422_v8 = vpack.c.bf16 (!%p139_p2), %v178_v7, %v177_v6  ;;  %v179_v9 = vld [vmem:[%s556_s1 + $0x30] sm:$0xff] (!%p139_p2)  ;;  %v180_v10 = vld [vmem:[%s556_s1 + $0x38] sm:$0xff] (!%p139_p2)  ;;  %v181_v13 = vld [vmem:[%s556_s1 + $0x40] sm:$0xff] (!%p139_p2) }
   0x8   : > { %415 = vmatprep.subr.bf16.mxu0 (!%p139_p2), %v414_v3  ;;  %v426_v12 = vpack.c.bf16 (!%p139_p2), %v180_v10, %v179_v9  ;;  %v182_v14 = vld [vmem:[%s556_s1 + $0x48] sm:$0xff] (!%p139_p2)  ;;  %v183_v16 = vld [vmem:[%s556_s1 + $0x50] sm:$0xff] (!%p139_p2)  ;;  %v184_v17 = vld [vmem:[%s556_s1 + $0x58] sm:$0xff] (!%p139_p2) }
   0x9   : > { %417 = vmatpush3.bf16.msra.mxu0 (!%p139_p2), %v414_v3  ;;  %v430_v15 = vpack.c.bf16 (!%p139_p2), %v182_v14, %v181_v13  ;;  %v434_v18 = vpack.c.bf16 (!%p139_p2), %v184_v17, %v183_v16  ;;  %v185_v19 = vld [vmem:[%s556_s1 + $0x60] sm:$0xff] (!%p139_p2)  ;;  %v186_v20 = vld [vmem:[%s556_s1 + $0x68] sm:$0xff] (!%p139_p2)  ;;  %v187_v22 = vld [vmem:[%s556_s1 + $0x70] sm:$0xff] (!%p139_p2) }
   0xa   : > { %419 = vmatprep.subr.bf16.mxu0 (!%p139_p2), %v418_v5  ;;  %v438_v21 = vpack.c.bf16 (!%p139_p2), %v186_v20, %v185_v19  ;;  %v188_v23 = vld [vmem:[%s556_s1 + $0x78] sm:$0xff] (!%p139_p2)  ;;  %v358_v26 = vld [vmem:[%s557_s2] ss:$0 sm:$0xff] (!%p139_p2) }
   0xb   : > { %v442_v24 = vpack.c.bf16 (!%p139_p2), %v188_v23, %v187_v22 }
   0xd   : > { %s560_s20 = smov (!%p162_p3, %s355_s20), 7  ;;  %421 = vmatpush3.bf16.msra.mxu0 %v418_v5  ;;  %s562_s13 = smov (!%p167_p4, %s488_s13), 3 }
   0xe   : > { %s356_s27 = sshll.u32 %s560_s20, 3  ;;  %423 = vmatprep.subr.bf16.mxu0 %v422_v8  ;;  %s357_s28 = sshll.u32 %s562_s13, 1 }
   0xf   : > { %s165_s7 = scalar_lea.vmem %s555_s0, %s356_s27  ;;  %s170_s4 = scalar_lea.vmem %s558_s3, %s357_s28 }
  0x10   : > { %v171_v11 = vld [vmem:[%s165_s7] sm:$0xff]  ;;  %v172_v25 = vld [vmem:[%s165_s7 + $0x8] sm:$0xff] }
  0x11   : > { %411 = vmatprep.mubr.f32.mxu0 %v171_v11  ;;  %425 = vmatpush3.bf16.msra.mxu0 %v422_v8 }
  0x12   : > { %427 = vmatprep.subr.bf16.mxu0 %v426_v12 }
  0x15   : > { %429 = vmatpush3.bf16.msra.mxu0 %v426_v12 }
  0x16   : > { %431 = vmatprep.subr.bf16.mxu0 %v430_v15 }
  0x19   : > { %433 = vmatpush3.bf16.msra.mxu0 %v430_v15 }
  0x1a   : > { %435 = vmatprep.subr.bf16.mxu0 %v434_v18 }
  0x1d   : > { %437 = vmatpush3.bf16.msra.mxu0 %v434_v18 }
  0x1e   : > { %439 = vmatprep.subr.bf16.mxu0 %v438_v21 }
  0x21   : > { %441 = vmatpush3.bf16.msra.mxu0 %v438_v21 }
  0x22   : > { %443 = vmatprep.subr.bf16.mxu0 %v442_v24 }
  0x25   : > { %445 = vmatpush3.bf16.msra.mxu0 %v442_v24 }
  0x28   : > { %412 = vmatmul.mubr.f32.vlgmr.msra.gmra.mrb[0].mxu0 %v172_v25 }
  0xfb   : > { %v413_v27 = vpop.f32.mrb[0].mxu0 }
  0xfc   : > { %v268_v28 = vadd.f32 %v413_v27, %v358_v26  ;;  %v262_v29 = vpop.f32.mrb[1].mxu0 }
  0xfd   : > { %v263_v30 = vadd.f32 %v358_v26, %v262_v29 }
  0xfe   : > { %v272_v31 = vmax.f32 %v268_v28, 0.0 }
  0xff   : > { %v271_v32 = vmax.f32 %v263_v30, 0.0 }
 0x100   : > { %v275_v33 = vsel %vm273_vm0, %v272_v31, 0.0  ;;  %v286_v34 = vmul.f32 %v272_v31, %v272_v31 }
 0x101   : > { %v274_v35 = vsel %vm273_vm0, %v271_v32, 0.0  ;;  %v285_v36 = vmul.f32 %v271_v32, %v271_v32 }
 0x102   : > { %v288_v37 = vsel %vm273_vm0, %v286_v34, 0.0  ;;  %v276_v38 = vadd.f32 %v275_v33, %v274_v35 }
 0x103   : > { %v287_v39 = vsel %vm273_vm0, %v285_v36, 0.0 }
 0x104   : > { %v277_v40 = vrot.slane %v276_v38, 4  ;;  %v289_v41 = vadd.f32 %v288_v37, %v287_v39 }
 0x106   : > { %v278_v42 = vadd.f32 %v277_v40, %v276_v38  ;;  %v290_v43 = vrot.slane %v289_v41, 4 }
 0x108   : > { %v279_v44 = vrot.slane %v278_v42, 2  ;;  %v291_v45 = vadd.f32 %v290_v43, %v289_v41 }
 0x10a   : > { %v280_v46 = vadd.f32 %v279_v44, %v278_v42  ;;  %v292_v47 = vrot.slane %v291_v45, 2 }
 0x10c   : > { %v281_v48 = vrot.slane %v280_v46, 1  ;;  %v293_v49 = vadd.f32 %v292_v47, %v291_v45 }
 0x10e   : > { %v282_v50 = vadd.f32 %v281_v48, %v280_v46  ;;  %v294_v51 = vrot.slane %v293_v49, 1 }
 0x110   : > { %284 = vst.msk [vmem:[%s170_s4] sm:$0x1] %vm283_vm1, %v282_v50  ;;  %v295_v52 = vadd.f32 %v294_v51, %v293_v49 }
 0x112   : > { %296 = vst.msk [vmem:[%s170_s4 + $0x1] sm:$0x1] %vm283_vm1, %v295_v52 }
 0x113 PF: > { %s13_s12 = sadd.s32 1, %s460_s12  }
 0x114   : > { %p10_p5 = scmp.ge.s32.totalorder %s13_s12, 6  }
 0x116   :  { %12 = sbr.rel (!%p10_p5) target bundleno = 1 (0x1), region = 62 }

// kernel: pixel_classifier_forward.5
= control target key start
LH: loop header
LB: loop body
LE: loop exit
PB: predicated region body
PF: predicated region fallthrough
CT: control target
= control target key end

     0   :  { %s652_s18 = smov 0   ;;  %s746_s0 = inlined_call_operand.vmem [shape: f32[64,128], index: 0, kind: input, shape index: {}]   ;;  %s747_s1 = inlined_call_operand.vmem [shape: f32[128,32], index: 1, kind: input, shape index: {}]   ;;  %s748_s2 = inlined_call_operand.vmem [shape: f32[1,32], index: 2, kind: input, shape index: {}]   ;;  %s749_s3 = inlined_call_operand.vmem [shape: f32[32,128], index: 3, kind: input, shape index: {}]   ;;  %s750_s4 = inlined_call_operand.vmem [shape: f32[1,128], index: 4, kind: input, shape index: {}]   ;;  %s751_s5 = inlined_call_operand.vmem [shape: f32[64,128], index: 5, kind: output, shape index: {}]  }
   0x1 LB: > { %s481_s19 = sadd.s32 4294967295, %s620_s18   ;;  %p485_p0 = scmp.ge.s32.totalorder %s620_s18, 1  ;;  %s620_s18 = sphi %s652_s18, %s15_s18  }
   0x2   : > { %p188_p1 = scmp.lt.s32.totalorder %s620_s18, 5 }
   0x4   : > { %p189_p2 = pnand %p485_p0, %p188_p1 }
   0x5   : > { %v230_v0 = vld [vmem:[%s747_s1] sm:$0xff] (!%p189_p2)  ;;  %v231_v1 = vld [vmem:[%s747_s1 + $0x8] sm:$0xff] (!%p189_p2)  ;;  %v232_v2 = vld [vmem:[%s747_s1 + $0x10] sm:$0xff] (!%p189_p2)  ;;  %s486_s26 = sshll.u32 (!%p189_p2), %s481_s19, 1  ;;  %vm341_vm0 = vcmask (!%p189_p2), 261120  }
   0x6   : > { %192 = sbr.rel (%p189_p2) target bundleno = 474 (0x1da), region = 40  ;;  %v566_v3 = vpack.c.bf16 (!%p189_p2), %v231_v1, %v230_v0  ;;  %v233_v4 = vld [vmem:[%s747_s1 + $0x18] sm:$0xff] (!%p189_p2)  ;;  %p217_p3 = scmp.lt.s32.totalorder (!%p189_p2), %s486_s26, 7  ;;  %v234_v6 = vld [vmem:[%s747_s1 + $0x20] sm:$0xff] (!%p189_p2)  ;;  %v235_v7 = vld [vmem:[%s747_s1 + $0x28] sm:$0xff] (!%p189_p2) }
   0x7   : > { %v570_v5 = vpack.c.bf16 (!%p189_p2), %v233_v4, %v232_v2  ;;  %v574_v8 = vpack.c.bf16 (!%p189_p2), %v235_v7, %v234_v6  ;;  %v330_v9 = vld [vmem:[%s749_s3] sm:$0xff] (!%p189_p2)  ;;  %v331_v10 = vld [vmem:[%s749_s3 + $0x8] sm:$0xff] (!%p189_p2)  ;;  %v236_v11 = vld [vmem:[%s747_s1 + $0x30] sm:$0xff] (!%p189_p2) }
   0x8   : > { %567 = vmatprep.subr.bf16.mxu0 (!%p189_p2), %v566_v3  ;;  %v237_v12 = vld [vmem:[%s747_s1 + $0x38] sm:$0xff] (!%p189_p2)  ;;  %v598_v13 = vpack.c.bf16 (!%p189_p2), %v331_v10, %v330_v9  ;;  %v238_v16 = vld [vmem:[%s747_s1 + $0x40] sm:$0xff] (!%p189_p2)  ;;  %v239_v17 = vld [vmem:[%s747_s1 + $0x48] sm:$0xff] (!%p189_p2) }
   0x9   : > { %569 = vmatpush3.bf16.msra.mxu0 (!%p189_p2), %v566_v3  ;;  %v578_v15 = vpack.c.bf16 (!%p189_p2), %v237_v12, %v236_v11  ;;  %v582_v18 = vpack.c.bf16 (!%p189_p2), %v239_v17, %v238_v16  ;;  %v240_v19 = vld [vmem:[%s747_s1 + $0x50] sm:$0xff] (!%p189_p2)  ;;  %v241_v20 = vld [vmem:[%s747_s1 + $0x58] sm:$0xff] (!%p189_p2)  ;;  %v242_v22 = vld [vmem:[%s747_s1 + $0x60] sm:$0xff] (!%p189_p2) }
   0xa   : > { %571 = vmatprep.subr.bf16.mxu0 (!%p189_p2), %v570_v5  ;;  %599 = vmatprep.subr.bf16.mxu1 (!%p189_p2), %v598_v13  ;;  %v586_v21 = vpack.c.bf16 (!%p189_p2), %v241_v20, %v240_v19  ;;  %v243_v23 = vld [vmem:[%s747_s1 + $0x68] sm:$0xff] (!%p189_p2)  ;;  %v244_v25 = vld [vmem:[%s747_s1 + $0x70] sm:$0xff] (!%p189_p2)  ;;  %v245_v26 = vld [vmem:[%s747_s1 + $0x78] sm:$0xff] (!%p189_p2) }
   0xb   : > { %601 = vmatpush3.bf16.msra.mxu1 (!%p189_p2), %v598_v13  ;;  %v590_v24 = vpack.c.bf16 (!%p189_p2), %v243_v23, %v242_v22  ;;  %v594_v27 = vpack.c.bf16 (!%p189_p2), %v245_v26, %v244_v25  ;;  %v332_v29 = vld [vmem:[%s749_s3 + $0x10] sm:$0xff] (!%p189_p2)  ;;  %v333_v30 = vld [vmem:[%s749_s3 + $0x18] sm:$0xff] (!%p189_p2)  ;;  %v490_v32 = vld [vmem:[%s748_s2] ss:$0 sm:$0xff] (!%p189_p2) }
   0xc   : > { %v602_v31 = vpack.c.bf16 (!%p189_p2), %v333_v30, %v332_v29  ;;  %v491_v39 = vld [vmem:[%s750_s4] ss:$0 sm:$0xff] (!%p189_p2) }
   0xd   : > { %s753_s26 = smov (!%p217_p3, %s486_s26), 7  ;;  %573 = vmatpush3.bf16.msra.mxu0 %v570_v5 }
   0xe   : > { %s487_s8 = sshll.u32 %s753_s26, 3  ;;  %575 = vmatprep.subr.bf16.mxu0 %v574_v8  ;;  %603 = vmatprep.subr.bf16.mxu1 %v602_v31 }
   0xf   : > { %s698_s20 = scalar_lea.vmem %s746_s0, %s487_s8  ;;  %605 = vmatpush3.bf16.msra.mxu1 %v602_v31  ;;  %s226_s25 = scalar_lea.vmem %s751_s5, %s487_s8 }
  0x10   : > { %v228_v14 = vld [vmem:[%s698_s20] sm:$0xff]  ;;  %v229_v28 = vld [vmem:[%s698_s20 + $0x8] sm:$0xff] }
  0x11   : > { %552 = vmatprep.mubr.f32.mxu0 %v228_v14  ;;  %577 = vmatpush3.bf16.msra.mxu0 %v574_v8 }
  0x12   : > { %579 = vmatprep.subr.bf16.mxu0 %v578_v15 }
  0x15   : > { %581 = vmatpush3.bf16.msra.mxu0 %v578_v15 }
  0x16   : > { %583 = vmatprep.subr.bf16.mxu0 %v582_v18 }
  0x19   : > { %585 = vmatpush3.bf16.msra.mxu0 %v582_v18 }
  0x1a   : > { %587 = vmatprep.subr.bf16.mxu0 %v586_v21 }
  0x1d   : > { %589 = vmatpush3.bf16.msra.mxu0 %v586_v21 }
  0x1e   : > { %591 = vmatprep.subr.bf16.mxu0 %v590_v24 }
  0x21   : > { %593 = vmatpush3.bf16.msra.mxu0 %v590_v24 }
  0x22   : > { %595 = vmatprep.subr.bf16.mxu0 %v594_v27 }
  0x25   : > { %597 = vmatpush3.bf16.msra.mxu0 %v594_v27 }
  0x28   : > { %553 = vmatmul.mubr.f32.vlgmr.msra.gmra.mrb[0].mxu0 %v229_v28 }
  0xfb   : > { %v554_v33 = vpop.f32.mrb[0].mxu0 }
  0xfc   : > { %v325_v34 = vadd.f32 %v554_v33, %v490_v32  ;;  %v319_v35 = vpop.f32.mrb[1].mxu0 }
  0xfd   : > { %v320_v36 = vadd.f32 %v490_v32, %v319_v35 }
  0xfe   : > { %v329_v38 = vmax.f32 %v325_v34, 0.0 }
  0xff   : > { %v328_v37 = vmax.f32 %v320_v36, 0.0 }
 0x101   : > { %563 = vmatprep.mubr.msk.f32.mxu1 %vm341_vm0, %v328_v37 }
 0x102   : > { %564 = vmatmul.mubr.msk.f32.vlgmr.msra.gmra.mrb[0].mxu1 %vm341_vm0, %v329_v38 }
 0x1d5   : > { %v565_v40 = vpop.f32.mrb[0].mxu1 }
 0x1d6   : > { %v414_v41 = vpop.f32.mrb[1].mxu1  ;;  %v420_v43 = vadd.f32 %v565_v40, %v491_v39 }
 0x1d7   : > { %v415_v42 = vadd.f32 %v491_v39, %v414_v41 }
 0x1d8   : > { %424 = vst [vmem:[%s226_s25 + $0x8] sm:$0xff] %v420_v43 }
 0x1d9   : > { %423 = vst [vmem:[%s226_s25] sm:$0xff] %v415_v42 }
 0x1da PF: > { %s15_s18 = sadd.s32 1, %s620_s18  }
 0x1db   : > { %p12_p4 = scmp.ge.s32.totalorder %s15_s18, 6  }
 0x1dd   :  { %14 = sbr.rel (!%p12_p4) target bundleno = 1 (0x1), region = 70 }

</bundles_post_ra>
